<compile_context>
chip_gen: v6e
topology: v6e:2x2x1
jax: 0.10.0
libtpu: 0.0.40
codegen_flags: <defaults>
</compile_context>

<pallas_src>
import jax
import jax.numpy as jnp
from jax.experimental import pallas as pl
from jax.experimental.pallas import tpu as pltpu

_MiB = 1024 * 1024


def _round_up(v, m):
    return ((v + m - 1) // m) * m


def _cdiv(a, b):
    return (a + b - 1) // b


def _vmem_budget():
    """Per-chip scoped-VMEM limit + tile-sizing budget (bytes)."""
    try:
        cap = int(getattr(pltpu.get_tpu_info(), "vmem_capacity_bytes", 64 * _MiB))
    except Exception:          # query unavailable -> assume the smallest (v7x-class) VMEM
        cap = 64 * _MiB
    if cap >= 128 * _MiB:      # v5e / v6e: 128 MiB physical VMEM
        limit = 100 * _MiB
    else:                      # v7x-class: 64 MiB physical VMEM
        limit = 40 * _MiB
    budget = limit - 8 * _MiB  # headroom for compiler-internal scratch
    return budget, limit, cap < 128 * _MiB


def slot_encoder_forward(x, w, b, num_slots, slot_size, *, fuse_projection=None):
    """x: (B, N, in_dim) -> slots: (B, num_slots, slot_size) float32.

    w: (in_dim, num_slots*slot_size); b: (num_slots*slot_size,) or (1, ...).
    x / w may be float32 or bfloat16 (bf16 halves x HBM traffic, bf16 MXU on
    v6e/v7x).  Precision contract: pooling, accumulation and bias add are f32;
    if w is bf16 the pooled mean is cast to bf16 for the single epilogue MXU
    matmul (f32 accumulation).
    """
    B, N, in_dim = x.shape
    out_dim = num_slots * slot_size
    assert w.shape == (in_dim, out_dim)
    b = jnp.asarray(b, jnp.float32).reshape(1, out_dim)

    budget, vmem_limit, small_vmem = _vmem_budget()

    # ---- lane packing for small in_dim --------------------------------------
    # in_dim is the lane (last, 128-wide) axis.  For in_dim < 128 dividing 128,
    # fold g = 128 // in_dim consecutive tokens into the lane axis with a free
    # contiguous reshape and stack W g times:  packed_sum @ W_stacked == sum @ W.
    g = 1
    if in_dim < 128 and 128 % in_dim == 0:
        gt = 128 // in_dim
        if gt > 1 and N % gt == 0:
            g = gt
    if g > 1:
        x_k = x.reshape(B, N // g, g * in_dim)   # contiguous reshape: no HBM copy
        w_k = jnp.tile(w, (g, 1))                # (g*in_dim, out_dim), tiny
    else:
        x_k, w_k = x, w
    Nk, Dk = x_k.shape[1], x_k.shape[2]
    inv_n = 1.0 / float(N)

    x_bytes = jnp.dtype(x_k.dtype).itemsize
    w_bytes = jnp.dtype(w_k.dtype).itemsize
    Dk_pad = _round_up(Dk, 128)
    out_pad = _round_up(out_dim, 128)            # lane-dense output slab

    # ---- keep W resident (fused projection) only if it fits comfortably -----
    w_foot = _round_up(Dk, 8) * out_pad * w_bytes          # single-buffered footprint
    if fuse_projection is None:
        fuse_projection = w_foot <= budget // 3

    # ---- tile sizing from the lane-padded VMEM footprint ---------------------
    Bt = min(_round_up(B, 8), 256)
    if small_vmem and B >= 16 and _round_up(B, 8) // Bt < 2:
        # v7x has 2 TensorCores: give the 'parallel' batch axis >= 2 steps.
        # TODO(synk): for tiny-B / huge-N, sharding the token reduction across both
        # cores (core_map + per-core partial sums) would use the 2nd TC as well.
        Bt = _round_up(_cdiv(_round_up(B, 8), 2), 8)

    def _fixed_foot(bt):
        out_cols = out_pad if fuse_projection else Dk_pad
        f = 2 * bt * out_cols * 4                # double-buffered output block
        f += bt * Dk_pad * 4                     # f32 accumulator scratch
        if fuse_projection:
            f += w_foot + 8 * out_pad * 4        # resident W + bias
        return f

    sub = 16 if x_bytes == 2 else 8              # sublane granule (bf16 packs 2 rows)
    while True:
        rem_budget = budget - _fixed_foot(Bt)
        per_tok = 2 * Bt * Dk_pad * x_bytes      # 2 pipeline buffers of x, per token row
        nt_cap = rem_budget // per_tok if rem_budget > 0 else 0
        if nt_cap >= sub or Bt <= 8:
            break
        Bt = max(8, _round_up(Bt // 2, 8))
    nt_cap = max(nt_cap, sub)
    # Balance the token grid so the last tile is not mostly padding.
    n_steps = max(1, _cdiv(Nk, nt_cap))
    Nt = _round_up(_cdiv(Nk, n_steps), sub)
    Nt = min(Nt, _round_up(Nk, sub), max(sub, (nt_cap // sub) * sub))

    grid = (_cdiv(B, Bt), _cdiv(Nk, Nt))         # reduction (token) axis last
    n_tok_tiles = grid[1]
    tail = Nk % Nt                                # real rows in the last token tile

    compiler_params = pltpu.CompilerParams(
        dimension_semantics=("parallel", "arbitrary"),
        vmem_limit_bytes=vmem_limit,
    )

    # ---- kernels -------------------------------------------------------------
    def _accumulate(x_ref, acc_ref, t):
        @pl.when(t == 0)
        def _():
            acc_ref[...] = jnp.zeros_like(acc_ref)

        if tail == 0:
            # Upcast fused into the reduction -> no full-tile f32 temporary.
            acc_ref[...] += jnp.sum(x_ref[...], axis=1, dtype=jnp.float32)
        else:
            @pl.when(t < n_tok_tiles - 1)
            def _():
                acc_ref[...] += jnp.sum(x_ref[...], axis=1, dtype=jnp.float32)

            @pl.when(t == n_tok_tiles - 1)
            def _():
                # Overhanging token tile: only the first `tail` rows hold real data
                # (Pallas clips the DMA); a static sub-slice avoids both a mask
                # tensor and reading stale buffer rows.
                acc_ref[...] += jnp.sum(x_ref[:, :tail, :], axis=1,
                                        dtype=jnp.float32)

    def fused_kernel(x_ref, w_ref, b_ref, o_ref, acc_ref):
        t = pl.program_id(1)
        _accumulate(x_ref, acc_ref, t)

        @pl.when(t == n_tok_tiles - 1)
        def _():
            pooled = (acc_ref[...] * inv_n).astype(w_ref.dtype)   # f32 if w is f32
            y = jnp.dot(pooled, w_ref[...], preferred_element_type=jnp.float32)
            o_ref[...] = (y + b_ref[...]).astype(o_ref.dtype)     # bias only in epilogue

    def pool_kernel(x_ref, o_ref, acc_ref):
        t = pl.program_id(1)
        _accumulate(x_ref, acc_ref, t)

        @pl.when(t == n_tok_tiles - 1)
        def _():
            o_ref[...] = acc_ref[...] * inv_n

    x_spec = pl.BlockSpec((Bt, Nt, Dk), lambda bi, ti: (bi, ti, 0))
    acc_scratch = pltpu.VMEM((Bt, Dk), jnp.float32)

    if not fuse_projection:
        # W too large to sit in VMEM next to double-buffered x tiles: pool in
        # Pallas (that is where all the HBM traffic is) and let XLA run the
        # standard tiled matmul on the tiny (B, Dk) pooled tensor.
        pooled = pl.pallas_call(
            pool_kernel,
            out_shape=jax.ShapeDtypeStruct((B, Dk), jnp.float32),
            grid=grid,
            in_specs=[x_spec],
            out_specs=pl.BlockSpec((Bt, Dk), lambda bi, ti: (bi, 0)),
            scratch_shapes=[acc_scratch],
            compiler_params=compiler_params,
        )(x_k)
        y = jnp.dot(pooled.astype(w_k.dtype), w_k,
                    preferred_element_type=jnp.float32) + b
        return y.reshape(B, num_slots, slot_size)

    # Cheap pads for W / bias only (never for x).
    if out_pad != out_dim:
        wp = jnp.pad(w_k, ((0, 0), (0, out_pad - out_dim)))
        bp = jnp.pad(b, ((0, 0), (0, out_pad - out_dim)))
    else:
        wp, bp = w_k, b

    def _const_spec(shape, pm):
        if pm is None:
            return pl.BlockSpec(shape, lambda bi, ti: (0, 0))
        return pl.BlockSpec(shape, lambda bi, ti: (0, 0), pipeline_mode=pm)

    def _run(pm):
        return pl.pallas_call(
            fused_kernel,
            out_shape=jax.ShapeDtypeStruct((B, out_pad), jnp.float32),
            grid=grid,
            in_specs=[x_spec,
                      _const_spec((Dk, out_pad), pm),   # resident W
                      _const_spec((1, out_pad), pm)],   # resident bias
            out_specs=pl.BlockSpec((Bt, out_pad), lambda bi, ti: (bi, 0)),
            scratch_shapes=[acc_scratch],
            compiler_params=compiler_params,
        )(x_k, wp, bp)

    try:
        # Constant index map -> fetched once; single-buffering halves W's VMEM
        # residency (matters most on v7x's 64 MiB VMEM).
        flat = jax.block_until_ready(_run(pl.Buffered(1)))
    except Exception:
        flat = _run(None)   # fall back to default pipelining if Buffered(1) is rejected

    return flat[:, :out_dim].reshape(B, num_slots, slot_size)


def init_params(key, in_dim, num_slots, slot_size):
    out_dim = num_slots * slot_size
    kw, kb = jax.random.split(key)
    w = jax.random.normal(kw, (in_dim, out_dim), dtype=jnp.float32) * (1.0 / in_dim ** 0.5)
    b = jax.random.normal(kb, (1, out_dim), dtype=jnp.float32) * 0.01
    return w, b


if __name__ == "__main__":
    # Small shapes consistent with the module's __init__ signature.
    B, N = 2, 8
    in_dim, num_slots, slot_size = 32, 4, 16

    key = jax.random.PRNGKey(0)
    kx, kp = jax.random.split(key)
    x = jax.random.normal(kx, (B, N, in_dim), dtype=jnp.float32)
    w, b = init_params(kp, in_dim, num_slots, slot_size)
    ref = (jnp.mean(x, axis=1) @ w + b).reshape(B, num_slots, slot_size)

    # f32 path (exercises the small-in_dim lane-packing + fused projection).
    slots = jax.block_until_ready(slot_encoder_forward(x, w, b, num_slots, slot_size))
    assert slots.shape == (B, num_slots, slot_size)
    assert jnp.allclose(slots, ref, atol=1e-5, rtol=1e-5)

    # bf16 x/W path (halves HBM bytes for x; bf16 MXU on v6e/v7x); f32 accumulation.
    slots_bf16 = jax.block_until_ready(
        slot_encoder_forward(x.astype(jnp.bfloat16), w.astype(jnp.bfloat16),
                             b, num_slots, slot_size))
    assert jnp.allclose(slots_bf16, ref, atol=5e-2, rtol=5e-2)

    # Non-dividing shapes: no lane packing (128 % 48 != 0) and a token tail tile.
    B2, N2, in_dim2 = 3, 23, 48
    x2 = jax.random.normal(kx, (B2, N2, in_dim2), dtype=jnp.float32)
    w2, b2 = init_params(kp, in_dim2, num_slots, slot_size)
    slots2 = jax.block_until_ready(slot_encoder_forward(x2, w2, b2, num_slots, slot_size))
    ref2 = (jnp.mean(x2, axis=1) @ w2 + b2).reshape(B2, num_slots, slot_size)
    assert jnp.allclose(slots2, ref2, atol=1e-5, rtol=1e-5)

    # Exercise the pool-only + XLA-matmul split path (used automatically when W
    # is too large to keep resident in VMEM).
    slots3 = jax.block_until_ready(
        slot_encoder_forward(x, w, b, num_slots, slot_size, fuse_projection=False))
    assert jnp.allclose(slots3, ref, atol=1e-5, rtol=1e-5)

    print("KERNEL_OK")
</pallas_src>

<mosaic_0001>
module attributes {stable_mosaic.version = 11 : i64} {
  func.func @fused_kernel(%arg0: i32, %arg1: i32, %arg2: memref<8x8x128xf32, #tpu.memory_space<vmem>>, %arg3: memref<128x128xf32, #tpu.memory_space<vmem>>, %arg4: memref<1x128xf32, #tpu.memory_space<vmem>>, %arg5: memref<8x128xf32, #tpu.memory_space<vmem>>, %arg6: memref<8x128xf32, #tpu.memory_space<vmem>>) attributes {dimension_semantics = [#tpu.dimension_semantics<parallel>, #tpu.dimension_semantics<arbitrary>], iteration_bounds = array<i64: 1, 1>, scalar_prefetch = 0 : i64, scratch_operands = 1 : i64, tpu.core_type = #tpu.core_type<tc>, window_params = [{transform_indices = @transform_0, window_bounds = array<i64: 8, 8, 128>}, {pipeline_mode = #tpu.pipeline_mode<synchronous>, transform_indices = @transform_1, window_bounds = array<i64: 128, 128>}, {pipeline_mode = #tpu.pipeline_mode<synchronous>, transform_indices = @transform_2, window_bounds = array<i64: 1, 128>}, {transform_indices = @transform_3, window_bounds = array<i64: 8, 128>}]} {
    %c0_i32 = arith.constant 0 : i32
    %0 = arith.cmpi eq, %arg1, %c0_i32 : i32
    %1 = arith.extui %0 : i1 to i32
    %c0_i32_0 = arith.constant 0 : i32
    %2 = arith.cmpi ne, %1, %c0_i32_0 : i32
    scf.if %2 {
      %cst = arith.constant 0.000000e+00 : f32
      %12 = vector.broadcast %cst : f32 to vector<8x128xf32>
      %c0 = arith.constant 0 : index
      %c0_7 = arith.constant 0 : index
      %13 = vector.load %arg6[%c0, %c0_7] : memref<8x128xf32, #tpu.memory_space<vmem>>, vector<8x128xf32>
      tpu.vector_store %arg6[%c0, %c0_7], %12 {strides = array<i32>} : memref<8x128xf32, #tpu.memory_space<vmem>>, vector<8x128xf32>,
    } else {
    }
    %c0_i32_1 = arith.constant 0 : i32
    %3 = arith.cmpi slt, %arg1, %c0_i32_1 : i32
    %4 = arith.extui %3 : i1 to i32
    %c0_i32_2 = arith.constant 0 : i32
    %5 = arith.cmpi ne, %4, %c0_i32_2 : i32
    scf.if %5 {
      %c0 = arith.constant 0 : index
      %c0_7 = arith.constant 0 : index
      %12 = vector.load %arg6[%c0, %c0_7] : memref<8x128xf32, #tpu.memory_space<vmem>>, vector<8x128xf32>
      %c0_8 = arith.constant 0 : index
      %c0_9 = arith.constant 0 : index
      %c0_10 = arith.constant 0 : index
      %13 = vector.load %arg2[%c0_8, %c0_9, %c0_10] : memref<8x8x128xf32, #tpu.memory_space<vmem>>, vector<8x8x128xf32>
      %cst = arith.constant dense<0.000000e+00> : vector<8x128xf32>
      %14 = vector.multi_reduction <add>, %13, %cst [1] : vector<8x8x128xf32> to vector<8x128xf32>
      %15 = arith.addf %12, %14 : vector<8x128xf32>
      %c0_11 = arith.constant 0 : index
      %c0_12 = arith.constant 0 : index
      %16 = vector.load %arg6[%c0_11, %c0_12] : memref<8x128xf32, #tpu.memory_space<vmem>>, vector<8x128xf32>
      tpu.vector_store %arg6[%c0_11, %c0_12], %15 {strides = array<i32>} : memref<8x128xf32, #tpu.memory_space<vmem>>, vector<8x128xf32>,
    } else {
    }
    %c0_i32_3 = arith.constant 0 : i32
    %6 = arith.cmpi eq, %arg1, %c0_i32_3 : i32
    %7 = arith.extui %6 : i1 to i32
    %c0_i32_4 = arith.constant 0 : i32
    %8 = arith.cmpi ne, %7, %c0_i32_4 : i32
    scf.if %8 {
      %c0 = arith.constant 0 : index
      %c0_7 = arith.constant 0 : index
      %12 = vector.load %arg6[%c0, %c0_7] : memref<8x128xf32, #tpu.memory_space<vmem>>, vector<8x128xf32>
      %c0_8 = arith.constant 0 : index
      %c0_9 = arith.constant 0 : index
      %c0_10 = arith.constant 0 : index
      %13 = vector.load %arg2[%c0_8, %c0_9, %c0_10] : memref<8x8x128xf32, #tpu.memory_space<vmem>>, vector<8x2x128xf32>
      %cst = arith.constant dense<0.000000e+00> : vector<8x128xf32>
      %14 = vector.multi_reduction <add>, %13, %cst [1] : vector<8x2x128xf32> to vector<8x128xf32>
      %15 = arith.addf %12, %14 : vector<8x128xf32>
      %c0_11 = arith.constant 0 : index
      %c0_12 = arith.constant 0 : index
      %16 = vector.load %arg6[%c0_11, %c0_12] : memref<8x128xf32, #tpu.memory_space<vmem>>, vector<8x128xf32>
      tpu.vector_store %arg6[%c0_11, %c0_12], %15 {strides = array<i32>} : memref<8x128xf32, #tpu.memory_space<vmem>>, vector<8x128xf32>,
    } else {
    }
    %c0_i32_5 = arith.constant 0 : i32
    %9 = arith.cmpi eq, %arg1, %c0_i32_5 : i32
    %10 = arith.extui %9 : i1 to i32
    %c0_i32_6 = arith.constant 0 : i32
    %11 = arith.cmpi ne, %10, %c0_i32_6 : i32
    scf.if %11 {
      %c0 = arith.constant 0 : index
      %c0_7 = arith.constant 0 : index
      %12 = vector.load %arg6[%c0, %c0_7] : memref<8x128xf32, #tpu.memory_space<vmem>>, vector<8x128xf32>
      %cst = arith.constant 1.250000e-01 : f32
      %13 = vector.broadcast %cst : f32 to vector<8x128xf32>
      %14 = arith.mulf %12, %13 : vector<8x128xf32>
      %c0_8 = arith.constant 0 : index
      %c0_9 = arith.constant 0 : index
      %15 = vector.load %arg3[%c0_8, %c0_9] : memref<128x128xf32, #tpu.memory_space<vmem>>, vector<128x128xf32>
      %cst_10 = arith.constant dense<0.000000e+00> : vector<8x128xf32>
      %16 = tpu.matmul %14, %15, %cst_10 {dimension_numbers = #tpu.dot_dimension_numbers<[1], [0], [0], [1], [0, 0, 1, 1], [], []>} : vector<8x128xf32>, vector<128x128xf32>, vector<8x128xf32> -> vector<8x128xf32>
      %c0_11 = arith.constant 0 : index
      %c0_12 = arith.constant 0 : index
      %17 = vector.load %arg4[%c0_11, %c0_12] : memref<1x128xf32, #tpu.memory_space<vmem>>, vector<1x128xf32>
      %18 = vector.broadcast %17 : vector<1x128xf32> to vector<8x128xf32>
      %19 = arith.addf %16, %18 : vector<8x128xf32>
      %c0_13 = arith.constant 0 : index
      %c0_14 = arith.constant 0 : index
      %20 = vector.load %arg5[%c0_13, %c0_14] : memref<8x128xf32, #tpu.memory_space<vmem>>, vector<8x128xf32>
      tpu.vector_store %arg5[%c0_13, %c0_14], %19 {strides = array<i32>} : memref<8x128xf32, #tpu.memory_space<vmem>>, vector<8x128xf32>,
    } else {
    }
    return
  }
  func.func @transform_0(%arg0: i32, %arg1: i32) -> (i32, i32, i32) {
    %c0_i32 = arith.constant 0 : i32
    %c0_i32_0 = arith.constant 0 : i32
    return %arg0, %arg1, %c0_i32 : i32, i32, i32
  }
  func.func @transform_1(%arg0: i32, %arg1: i32) -> (i32, i32) {
    %c0_i32 = arith.constant 0 : i32
    %c0_i32_0 = arith.constant 0 : i32
    %c0_i32_1 = arith.constant 0 : i32
    return %c0_i32, %c0_i32_0 : i32, i32
  }
  func.func @transform_2(%arg0: i32, %arg1: i32) -> (i32, i32) {
    %c0_i32 = arith.constant 0 : i32
    %c0_i32_0 = arith.constant 0 : i32
    %c0_i32_1 = arith.constant 0 : i32
    return %c0_i32, %c0_i32_0 : i32, i32
  }
  func.func @transform_3(%arg0: i32, %arg1: i32) -> (i32, i32) {
    %c0_i32 = arith.constant 0 : i32
    %c0_i32_0 = arith.constant 0 : i32
    return %arg0, %c0_i32 : i32, i32
  }
}

module attributes {stable_mosaic.version = 11 : i64} {
  func.func @fused_kernel(%arg0: i32, %arg1: i32, %arg2: memref<8x8x128xf32, #tpu.memory_space<vmem>>, %arg3: memref<128x128xf32, #tpu.memory_space<vmem>>, %arg4: memref<1x128xf32, #tpu.memory_space<vmem>>, %arg5: memref<8x128xf32, #tpu.memory_space<vmem>>, %arg6: memref<8x128xf32, #tpu.memory_space<vmem>>) attributes {dimension_semantics = [#tpu.dimension_semantics<parallel>, #tpu.dimension_semantics<arbitrary>], iteration_bounds = array<i64: 1, 1>, scalar_prefetch = 0 : i64, scratch_operands = 1 : i64, tpu.core_type = #tpu.core_type<tc>, window_params = [{transform_indices = @transform_0, window_bounds = array<i64: 8, 8, 128>}, {pipeline_mode = #tpu.pipeline_mode<synchronous>, transform_indices = @transform_1, window_bounds = array<i64: 128, 128>}, {pipeline_mode = #tpu.pipeline_mode<synchronous>, transform_indices = @transform_2, window_bounds = array<i64: 1, 128>}, {transform_indices = @transform_3, window_bounds = array<i64: 8, 128>}]} {
    %c0_i32 = arith.constant 0 : i32
    %0 = arith.cmpi eq, %arg1, %c0_i32 : i32
    %1 = arith.extui %0 : i1 to i32
    %c0_i32_0 = arith.constant 0 : i32
    %2 = arith.cmpi ne, %1, %c0_i32_0 : i32
    scf.if %2 {
      %cst = arith.constant 0.000000e+00 : f32
      %12 = vector.broadcast %cst : f32 to vector<8x128xf32>
      %c0 = arith.constant 0 : index
      %c0_7 = arith.constant 0 : index
      %13 = vector.load %arg6[%c0, %c0_7] : memref<8x128xf32, #tpu.memory_space<vmem>>, vector<8x128xf32>
      tpu.vector_store %arg6[%c0, %c0_7], %12 {strides = array<i32>} : memref<8x128xf32, #tpu.memory_space<vmem>>, vector<8x128xf32>,
    } else {
    }
    %c0_i32_1 = arith.constant 0 : i32
    %3 = arith.cmpi slt, %arg1, %c0_i32_1 : i32
    %4 = arith.extui %3 : i1 to i32
    %c0_i32_2 = arith.constant 0 : i32
    %5 = arith.cmpi ne, %4, %c0_i32_2 : i32
    scf.if %5 {
      %c0 = arith.constant 0 : index
      %c0_7 = arith.constant 0 : index
      %12 = vector.load %arg6[%c0, %c0_7] : memref<8x128xf32, #tpu.memory_space<vmem>>, vector<8x128xf32>
      %c0_8 = arith.constant 0 : index
      %c0_9 = arith.constant 0 : index
      %c0_10 = arith.constant 0 : index
      %13 = vector.load %arg2[%c0_8, %c0_9, %c0_10] : memref<8x8x128xf32, #tpu.memory_space<vmem>>, vector<8x8x128xf32>
      %cst = arith.constant dense<0.000000e+00> : vector<8x128xf32>
      %14 = vector.multi_reduction <add>, %13, %cst [1] : vector<8x8x128xf32> to vector<8x128xf32>
      %15 = arith.addf %12, %14 : vector<8x128xf32>
      %c0_11 = arith.constant 0 : index
      %c0_12 = arith.constant 0 : index
      %16 = vector.load %arg6[%c0_11, %c0_12] : memref<8x128xf32, #tpu.memory_space<vmem>>, vector<8x128xf32>
      tpu.vector_store %arg6[%c0_11, %c0_12], %15 {strides = array<i32>} : memref<8x128xf32, #tpu.memory_space<vmem>>, vector<8x128xf32>,
    } else {
    }
    %c0_i32_3 = arith.constant 0 : i32
    %6 = arith.cmpi eq, %arg1, %c0_i32_3 : i32
    %7 = arith.extui %6 : i1 to i32
    %c0_i32_4 = arith.constant 0 : i32
    %8 = arith.cmpi ne, %7, %c0_i32_4 : i32
    scf.if %8 {
      %c0 = arith.constant 0 : index
      %c0_7 = arith.constant 0 : index
      %12 = vector.load %arg6[%c0, %c0_7] : memref<8x128xf32, #tpu.memory_space<vmem>>, vector<8x128xf32>
      %c0_8 = arith.constant 0 : index
      %c0_9 = arith.constant 0 : index
      %c0_10 = arith.constant 0 : index
      %13 = vector.load %arg2[%c0_8, %c0_9, %c0_10] : memref<8x8x128xf32, #tpu.memory_space<vmem>>, vector<8x2x128xf32>
      %cst = arith.constant dense<0.000000e+00> : vector<8x128xf32>
      %14 = vector.multi_reduction <add>, %13, %cst [1] : vector<8x2x128xf32> to vector<8x128xf32>
      %15 = arith.addf %12, %14 : vector<8x128xf32>
      %c0_11 = arith.constant 0 : index
      %c0_12 = arith.constant 0 : index
      %16 = vector.load %arg6[%c0_11, %c0_12] : memref<8x128xf32, #tpu.memory_space<vmem>>, vector<8x128xf32>
      tpu.vector_store %arg6[%c0_11, %c0_12], %15 {strides = array<i32>} : memref<8x128xf32, #tpu.memory_space<vmem>>, vector<8x128xf32>,
    } else {
    }
    %c0_i32_5 = arith.constant 0 : i32
    %9 = arith.cmpi eq, %arg1, %c0_i32_5 : i32
    %10 = arith.extui %9 : i1 to i32
    %c0_i32_6 = arith.constant 0 : i32
    %11 = arith.cmpi ne, %10, %c0_i32_6 : i32
    scf.if %11 {
      %c0 = arith.constant 0 : index
      %c0_7 = arith.constant 0 : index
      %12 = vector.load %arg6[%c0, %c0_7] : memref<8x128xf32, #tpu.memory_space<vmem>>, vector<8x128xf32>
      %cst = arith.constant 1.250000e-01 : f32
      %13 = vector.broadcast %cst : f32 to vector<8x128xf32>
      %14 = arith.mulf %12, %13 : vector<8x128xf32>
      %c0_8 = arith.constant 0 : index
      %c0_9 = arith.constant 0 : index
      %15 = vector.load %arg3[%c0_8, %c0_9] : memref<128x128xf32, #tpu.memory_space<vmem>>, vector<128x128xf32>
      %cst_10 = arith.constant dense<0.000000e+00> : vector<8x128xf32>
      %16 = tpu.matmul %14, %15, %cst_10 {dimension_numbers = #tpu.dot_dimension_numbers<[1], [0], [0], [1], [0, 0, 1, 1], [], []>} : vector<8x128xf32>, vector<128x128xf32>, vector<8x128xf32> -> vector<8x128xf32>
      %c0_11 = arith.constant 0 : index
      %c0_12 = arith.constant 0 : index
      %17 = vector.load %arg4[%c0_11, %c0_12] : memref<1x128xf32, #tpu.memory_space<vmem>>, vector<1x128xf32>
      %18 = vector.broadcast %17 : vector<1x128xf32> to vector<8x128xf32>
      %19 = arith.addf %16, %18 : vector<8x128xf32>
      %c0_13 = arith.constant 0 : index
      %c0_14 = arith.constant 0 : index
      %20 = vector.load %arg5[%c0_13, %c0_14] : memref<8x128xf32, #tpu.memory_space<vmem>>, vector<8x128xf32>
      tpu.vector_store %arg5[%c0_13, %c0_14], %19 {strides = array<i32>} : memref<8x128xf32, #tpu.memory_space<vmem>>, vector<8x128xf32>,
    } else {
    }
    return
  }
  func.func @transform_0(%arg0: i32, %arg1: i32) -> (i32, i32, i32) {
    %c0_i32 = arith.constant 0 : i32
    %c0_i32_0 = arith.constant 0 : i32
    return %arg0, %arg1, %c0_i32 : i32, i32, i32
  }
  func.func @transform_1(%arg0: i32, %arg1: i32) -> (i32, i32) {
    %c0_i32 = arith.constant 0 : i32
    %c0_i32_0 = arith.constant 0 : i32
    %c0_i32_1 = arith.constant 0 : i32
    return %c0_i32, %c0_i32_0 : i32, i32
  }
  func.func @transform_2(%arg0: i32, %arg1: i32) -> (i32, i32) {
    %c0_i32 = arith.constant 0 : i32
    %c0_i32_0 = arith.constant 0 : i32
    %c0_i32_1 = arith.constant 0 : i32
    return %c0_i32, %c0_i32_0 : i32, i32
  }
  func.func @transform_3(%arg0: i32, %arg1: i32) -> (i32, i32) {
    %c0_i32 = arith.constant 0 : i32
    %c0_i32_0 = arith.constant 0 : i32
    return %arg0, %c0_i32 : i32, i32
  }
}

</mosaic_0001>

<bundles_post_ra>
// kernel: tpu_custom_call.1
= control target key start
LH: loop header
LB: loop body
LE: loop exit
PB: predicated region body
PF: predicated region fallthrough
CT: control target
= control target key end

     0   :  { %8 = vsyncpa [#allocation4], 0  ;;  %s557_s0 = inlined_call_operand.hbm [shape: f32[2,2,128], index: 0, kind: input, shape index: {}]   ;;  %s558_s1 = inlined_call_operand.hbm [shape: f32[128,128], index: 1, kind: input, shape index: {}]   ;;  %s559_s2 = inlined_call_operand.vmem [shape: f32[1,128], index: 2, kind: input, shape index: {}]   ;;  %s560_s3 = inlined_call_operand.hbm [shape: f32[2,128], index: 3, kind: output, shape index: {}]  }
   0x1   :  { %9 = vsyncpa [#allocation7], 0 }
   0x2   :  { %10 = vsyncpa [#allocation5], 0 }
   0x3   :  { %15 = vsyncadd [#allocation4], 960  ;;  %s20_s12 = sld [smem:[#allocation0]]   ;;  %s483_s13 = smov [#allocation3]  }
   0x4   :  { %s28_s14 = sshll.u32 %s483_s13, 4  ;;  %s484_s15 = smov 32   ;;  %s29_s14 = int_to_ptr.vmem [resolvable:$true] %s28_s14 }
   0x5   :  { %35 = sst [smem:[#allocation10]] %s484_s15  ;;  %s485_s16 = smov 128  }
   0x6   :  { %37 = sst [smem:[#allocation10 + $0x1]] %s485_s16  ;;  %s486_s17 = smov 1  }
   0x7   :  { %39 = sst [smem:[#allocation10 + $0x2]] %s486_s17  ;;  %s487_s20 = smov 2  }
   0x8   :  { %41 = sst [smem:[#allocation10 + $0x3]] %s484_s15  ;;  %s488_s21 = smov [#allocation4]  }
   0x9   :  { %s367_s18 = sshll.u32 %s20_s12, 26  ;;  %43 = sst [smem:[#allocation10 + $0x4]] %s484_s15 }
   0xa   :  { %s368_s19 = sadd.s32 134217728, %s367_s18  ;;  %45 = sst [smem:[#allocation10 + $0x5]] %s487_s20 }
   0xb   :  { %s489_s22 = smov 131072   ;;  %s490_s25 = smov [#allocation6]  }
   0xc   :  { %47 = dma.general %s557_s0, 64, %s29_s14, %s488_s21, %s489_s22, [#allocation10], %s368_s19, 0  }
   0xd   :  { %s53_s26 = sshll.u32 %s490_s25, 4  ;;  %s54_s26 = int_to_ptr.vmem [resolvable:$true] %s53_s26 }
   0xe   :  { %s445_s27 = scalar_lea.vmem %s54_s26, 2048  ;;  %p450_p1 = scmp.lt.s32.totalorder %s54_s26, %s54_s26 }
   0xf   :  { %p446_p0 = scmp.ne.s32.totalorder %s54_s26, %s445_s27  ;;  %p451_p2 = scmp.lt.s32.totalorder %s445_s27, %s445_s27 }
  0x11   :  { %p452_p3 = por %p451_p2, %p450_p1 }
  0x13   :  { %p453_p4 = pnand %p452_p3, %p446_p0 }
  0x15   :  { %456 = shalt.err (!%p453_p4)
}
  0x16   :  { %s491_s28 = smov 128   ;;  %s492_s29 = smov 8  }
  0x17   :  { %59 = dma.hbm_to_vmem [thread:$0]  %s558_s1, 2048, %s54_s26, [#allocation7], %s491_s28, %s491_s28, %s492_s29  }
  0x18   :  { %477 = dma.done.wait [#allocation4], 1024  }
  0x19   :  { %478 = vsyncadd [#allocation4], 4294966272 }
  0x1a   :  { %479 = dma.done.wait [#allocation7], 2048  }
  0x1b   :  { %480 = vsyncadd [#allocation7], 4294965248  ;;  %v493_v0 = vmov 0.0   ;;  %vm494_vm0 = vmmov 0   ;;  %v270_v1 = vld [vmem:[#allocation6 + $0x78] sm:$0xff]  ;;  %v269_v2 = vld [vmem:[#allocation6 + $0x70] sm:$0xff] }
  0x1c   :  { %387 = vmatprep.subr.mxu0 %v493_v0  ;;  %419 = vmatprep.mubr.msk.f32.mxu0 %vm494_vm0, %v493_v0  ;;  %v268_v3 = vld [vmem:[#allocation6 + $0x68] sm:$0xff]  ;;  %v267_v4 = vld [vmem:[#allocation6 + $0x60] sm:$0xff]  ;;  %v266_v5 = vld [vmem:[#allocation6 + $0x58] sm:$0xff]  ;;  %vm171_vm1 = vcmask 1041408   ;;  %vm236_vm2 = vcmask 1041409   ;;  %vm238_vm3 = vcmask 1042434  }
  0x1d   :  { %388 = vmatpush3.msra.mxu0 %v270_v1  ;;  %v163_v6 = vld [vmem:[#allocation3] sm:$0x3]  ;;  %v164_v7 = vld [vmem:[#allocation3 + $0x8] sm:$0x3]  ;;  %v165_v8 = vld [vmem:[#allocation3 + $0x10] sm:$0x3] }
  0x1e   :  { %389 = vmatprep.subr.mxu0 %v493_v0  ;;  %v166_v9 = vld [vmem:[#allocation3 + $0x18] sm:$0x3]  ;;  %v167_v10 = vld [vmem:[#allocation3 + $0x20] sm:$0x3]  ;;  %v168_v11 = vld [vmem:[#allocation3 + $0x28] sm:$0x3] }
  0x1f   :  { %390 = vmatpush3.msra.mxu0 %v269_v2  ;;  %v169_v12 = vld [vmem:[#allocation3 + $0x30] sm:$0x3]  ;;  %v170_v13 = vld [vmem:[#allocation3 + $0x38] sm:$0x3]  ;;  %v172_v15 = vsel %vm171_vm1, %v163_v6, 0.0  ;;  %v179_v16 = vsel %vm171_vm1, %v164_v7, 0.0 }
  0x20   :  { %391 = vmatprep.subr.mxu0 %v493_v0  ;;  %v265_v14 = vld [vmem:[#allocation6 + $0x50] sm:$0xff]  ;;  %v186_v17 = vsel %vm171_vm1, %v165_v8, 0.0  ;;  %v193_v18 = vsel %vm171_vm1, %v166_v9, 0.0  ;;  %v173_v19 = vrot.slane %v172_v15, 4  ;;  %v180_v20 = vrot.slane %v179_v16, 4  ;;  %v264_v23 = vld [vmem:[#allocation6 + $0x48] sm:$0xff] }
  0x21   :  { %392 = vmatpush3.msra.mxu0 %v268_v3  ;;  %v187_v21 = vrot.slane %v186_v17, 4  ;;  %v194_v22 = vrot.slane %v193_v18, 4  ;;  %v200_v24 = vsel %vm171_vm1, %v167_v10, 0.0  ;;  %v207_v25 = vsel %vm171_vm1, %v168_v11, 0.0  ;;  %v263_v32 = vld [vmem:[#allocation6 + $0x40] sm:$0xff]  ;;  %v262_v41 = vld [vmem:[#allocation6 + $0x38] sm:$0xff] }
  0x22   :  { %393 = vmatprep.subr.mxu0 %v493_v0  ;;  %v214_v26 = vsel %vm171_vm1, %v169_v12, 0.0  ;;  %v221_v27 = vsel %vm171_vm1, %v170_v13, 0.0  ;;  %v174_v28 = vadd.f32 %v173_v19, %v172_v15  ;;  %v181_v29 = vadd.f32 %v180_v20, %v179_v16  ;;  %v261_v50 = vld [vmem:[#allocation6 + $0x30] sm:$0xff]  ;;  %v260_v59 = vld [vmem:[#allocation6 + $0x28] sm:$0xff]  ;;  %v258_v11 = vld [vmem:[#allocation6 + $0x18] sm:$0xff] }
  0x23   :  { %394 = vmatpush3.msra.mxu0 %v267_v4  ;;  %v188_v30 = vadd.f32 %v187_v21, %v186_v17  ;;  %v195_v31 = vadd.f32 %v194_v22, %v193_v18  ;;  %v201_v33 = vrot.slane %v200_v24, 4  ;;  %v208_v34 = vrot.slane %v207_v25, 4  ;;  %v257_v16 = vld [vmem:[#allocation6 + $0x10] sm:$0xff]  ;;  %v256_v20 = vld [vmem:[#allocation6 + $0x8] sm:$0xff] }
  0x24   :  { %395 = vmatprep.subr.mxu0 %v493_v0  ;;  %v215_v35 = vrot.slane %v214_v26, 4  ;;  %v222_v36 = vrot.slane %v221_v27, 4  ;;  %v175_v37 = vrot.slane %v174_v28, 2  ;;  %v182_v38 = vrot.slane %v181_v29, 2 }
  0x25   :  { %396 = vmatpush3.msra.mxu0 %v266_v5  ;;  %v189_v39 = vrot.slane %v188_v30, 2  ;;  %v196_v40 = vrot.slane %v195_v31, 2  ;;  %v202_v42 = vadd.f32 %v201_v33, %v200_v24  ;;  %v209_v43 = vadd.f32 %v208_v34, %v207_v25  ;;  %v259_v5 = vld [vmem:[#allocation6 + $0x20] sm:$0xff] }
  0x26   :  { %397 = vmatprep.subr.mxu0 %v493_v0  ;;  %v216_v44 = vadd.f32 %v215_v35, %v214_v26  ;;  %v223_v45 = vadd.f32 %v222_v36, %v221_v27  ;;  %v176_v46 = vadd.f32 %v175_v37, %v174_v28  ;;  %v183_v47 = vadd.f32 %v182_v38, %v181_v29  ;;  %v369_v26 = vld [vmem:[%s559_s2] ss:$0 sm:$0xff] }
  0x27   :  { %398 = vmatpush3.msra.mxu0 %v265_v14  ;;  %v190_v48 = vadd.f32 %v189_v39, %v188_v30  ;;  %v197_v49 = vadd.f32 %v196_v40, %v195_v31  ;;  %v203_v51 = vrot.slane %v202_v42, 2  ;;  %v210_v52 = vrot.slane %v209_v43, 2 }
  0x28   :  { %399 = vmatprep.subr.mxu0 %v493_v0  ;;  %v217_v53 = vrot.slane %v216_v44, 2  ;;  %v224_v54 = vrot.slane %v223_v45, 2  ;;  %v177_v55 = vrot.slane %v176_v46, 1  ;;  %v184_v56 = vrot.slane %v183_v47, 1 }
  0x29   :  { %400 = vmatpush3.msra.mxu0 %v264_v23  ;;  %v191_v57 = vrot.slane %v190_v48, 1  ;;  %v198_v58 = vrot.slane %v197_v49, 1  ;;  %v204_v60 = vadd.f32 %v203_v51, %v202_v42  ;;  %v211_v61 = vadd.f32 %v210_v52, %v209_v43  ;;  %v255_v23 = vld [vmem:[#allocation6] sm:$0xff] }
  0x2a   :  { %401 = vmatprep.subr.mxu0 %v493_v0  ;;  %v218_v62 = vadd.f32 %v217_v53, %v216_v44  ;;  %v225_v63 = vadd.f32 %v224_v54, %v223_v45  ;;  %v178_v1 = vadd.f32 %v177_v55, %v176_v46  ;;  %v185_v2 = vadd.f32 %v184_v56, %v183_v47 }
  0x2b   :  { %402 = vmatpush3.msra.mxu0 %v263_v32  ;;  %v192_v3 = vadd.f32 %v191_v57, %v190_v48  ;;  %v199_v4 = vadd.f32 %v198_v58, %v197_v49  ;;  %v205_v6 = vrot.slane %v204_v60, 1  ;;  %v212_v7 = vrot.slane %v211_v61, 1 }
  0x2c   :  { %403 = vmatprep.subr.mxu0 %v493_v0  ;;  %v219_v8 = vrot.slane %v218_v62, 1  ;;  %v226_v9 = vrot.slane %v225_v63, 1  ;;  %v237_v10 = vsel %vm236_vm2, %v185_v2, %v178_v1  ;;  %vm240_vm4 = vcmask 1043459  }
  0x2d   :  { %404 = vmatpush3.msra.mxu0 %v262_v41  ;;  %v206_v12 = vadd.f32 %v205_v6, %v204_v60  ;;  %v213_v13 = vadd.f32 %v212_v7, %v211_v61  ;;  %vm242_vm5 = vcmask 1044484   ;;  %v239_v15 = vsel %vm238_vm3, %v192_v3, %v237_v10 }
  0x2e   :  { %405 = vmatprep.subr.mxu0 %v493_v0  ;;  %v220_v14 = vadd.f32 %v219_v8, %v218_v62  ;;  %vm244_vm6 = vcmask 1045509   ;;  %v227_v17 = vadd.f32 %v226_v9, %v225_v63  ;;  %v241_v18 = vsel %vm240_vm4, %v199_v4, %v239_v15 }
  0x2f   :  { %406 = vmatpush3.msra.mxu0 %v261_v50  ;;  %vm246_vm7 = vcmask 1046534   ;;  %v243_v19 = vsel %vm242_vm5, %v206_v12, %v241_v18  ;;  %vm248_vm8 = vcmask 1047559  }
  0x30   :  { %407 = vmatprep.subr.mxu0 %v493_v0  ;;  %v245_v21 = vsel %vm244_vm6, %v213_v13, %v243_v19 }
  0x31   :  { %408 = vmatpush3.msra.mxu0 %v260_v59  ;;  %v247_v22 = vsel %vm246_vm7, %v220_v14, %v245_v21 }
  0x32   :  { %409 = vmatprep.subr.mxu0 %v493_v0  ;;  %v249_v24 = vsel %vm248_vm8, %v227_v17, %v247_v22 }
  0x33   :  { %410 = vmatpush3.msra.mxu0 %v259_v5  ;;  %v254_v25 = vmul.f32 0.125, %v249_v24 }
  0x34   :  { %411 = vmatprep.subr.mxu0 %v493_v0 }
  0x35   :  { %412 = vmatpush3.msra.mxu0 %v258_v11 }
  0x36   :  { %413 = vmatprep.subr.mxu0 %v493_v0 }
  0x37   :  { %414 = vmatpush3.msra.mxu0 %v257_v16 }
  0x38   :  { %415 = vmatprep.subr.mxu0 %v493_v0 }
  0x39   :  { %416 = vmatpush3.msra.mxu0 %v256_v20 }
  0x3a   :  { %417 = vmatprep.subr.mxu0 %v493_v0 }
  0x3b   :  { %418 = vmatpush3.msra.mxu0 %v255_v23 }
  0x3c   :  { %420 = vmatmul.mubr.f32.vlgmr.msra.gmra.mxu0 %v254_v25 }
  0xfc   :  { %v344_v27 = vpop.f32.mrf.mxu0 }
  0xfd   :  { %v345_v28 = vadd.f32 %v369_v26, %v344_v27 }
  0xfe   :  { %v421_v29 = vpop.f32.mrf.mxu0 }
  0xff   :  { %348 = vst [vmem:[#allocation8] sm:$0xff] %v345_v28 }
 0x100   :  { %353 = vsyncadd [#allocation5], 96  ;;  %s495_s5 = smov [#allocation8]  }
 0x101   :  { %s354_s6 = sshll.u32 %s495_s5, 4  ;;  %s355_s6 = int_to_ptr.vmem [resolvable:$true] %s354_s6 }
 0x102   :  { %s457_s7 = scalar_lea.vmem %s355_s6, 32  ;;  %s461_s8 = scalar_lea.vmem %s355_s6, 128 }
 0x103   :  { %p458_p5 = scmp.ne.s32.totalorder %s355_s6, %s457_s7  ;;  %p462_p6 = scmp.lt.s32.totalorder %s355_s6, %s355_s6 }
 0x104   :  { %p463_p7 = scmp.lt.s32.totalorder %s461_s8, %s457_s7 }
 0x106   :  { %p464_p8 = por %p463_p7, %p462_p6 }
 0x108   :  { %p465_p9 = pnand %p464_p8, %p458_p5 }
 0x10a   :  { %468 = shalt.err (!%p465_p9)
}
 0x10b   :  { %s496_s9 = smov 32   ;;  %s497_s10 = smov 2  }
 0x10c   :  { %360 = dma.vmem_to_hbm [thread:$0]  %s355_s6, 32, %s560_s3, [#allocation5], %s496_s9, %s496_s9, %s497_s10  }
 0x10d   :  { %481 = dma.done.wait [#allocation5], 128  }
 0x10e   :  { %482 = vsyncadd [#allocation5], 4294967168 }
 0x10f   :  { %364 = vsyncpa [#allocation4], 1 }
 0x110   :  { %365 = vsyncpa [#allocation7], 1 }
 0x111   :  { %366 = vsyncpa [#allocation5], 1 }

// kernel: tpu_custom_call.1
= control target key start
LH: loop header
LB: loop body
LE: loop exit
PB: predicated region body
PF: predicated region fallthrough
CT: control target
= control target key end

     0   :  { %8 = vsyncpa [#allocation4], 0  ;;  %s557_s0 = inlined_call_operand.hbm [shape: f32[2,2,128], index: 0, kind: input, shape index: {}]   ;;  %s558_s1 = inlined_call_operand.hbm [shape: f32[128,128], index: 1, kind: input, shape index: {}]   ;;  %s559_s2 = inlined_call_operand.vmem [shape: f32[1,128], index: 2, kind: input, shape index: {}]   ;;  %s560_s3 = inlined_call_operand.hbm [shape: f32[2,128], index: 3, kind: output, shape index: {}]  }
   0x1   :  { %9 = vsyncpa [#allocation7], 0 }
   0x2   :  { %10 = vsyncpa [#allocation5], 0 }
   0x3   :  { %15 = vsyncadd [#allocation4], 960  ;;  %s20_s12 = sld [smem:[#allocation0]]   ;;  %s483_s13 = smov [#allocation3]  }
   0x4   :  { %s28_s14 = sshll.u32 %s483_s13, 4  ;;  %s484_s15 = smov 32   ;;  %s29_s14 = int_to_ptr.vmem [resolvable:$true] %s28_s14 }
   0x5   :  { %35 = sst [smem:[#allocation10]] %s484_s15  ;;  %s485_s16 = smov 128  }
   0x6   :  { %37 = sst [smem:[#allocation10 + $0x1]] %s485_s16  ;;  %s486_s17 = smov 1  }
   0x7   :  { %39 = sst [smem:[#allocation10 + $0x2]] %s486_s17  ;;  %s487_s20 = smov 2  }
   0x8   :  { %41 = sst [smem:[#allocation10 + $0x3]] %s484_s15  ;;  %s488_s21 = smov [#allocation4]  }
   0x9   :  { %s367_s18 = sshll.u32 %s20_s12, 26  ;;  %43 = sst [smem:[#allocation10 + $0x4]] %s484_s15 }
   0xa   :  { %s368_s19 = sadd.s32 134217728, %s367_s18  ;;  %45 = sst [smem:[#allocation10 + $0x5]] %s487_s20 }
   0xb   :  { %s489_s22 = smov 131072   ;;  %s490_s25 = smov [#allocation6]  }
   0xc   :  { %47 = dma.general %s557_s0, 64, %s29_s14, %s488_s21, %s489_s22, [#allocation10], %s368_s19, 0  }
   0xd   :  { %s53_s26 = sshll.u32 %s490_s25, 4  ;;  %s54_s26 = int_to_ptr.vmem [resolvable:$true] %s53_s26 }
   0xe   :  { %s445_s27 = scalar_lea.vmem %s54_s26, 2048  ;;  %p450_p1 = scmp.lt.s32.totalorder %s54_s26, %s54_s26 }
   0xf   :  { %p446_p0 = scmp.ne.s32.totalorder %s54_s26, %s445_s27  ;;  %p451_p2 = scmp.lt.s32.totalorder %s445_s27, %s445_s27 }
  0x11   :  { %p452_p3 = por %p451_p2, %p450_p1 }
  0x13   :  { %p453_p4 = pnand %p452_p3, %p446_p0 }
  0x15   :  { %456 = shalt.err (!%p453_p4)
}
  0x16   :  { %s491_s28 = smov 128   ;;  %s492_s29 = smov 8  }
  0x17   :  { %59 = dma.hbm_to_vmem [thread:$0]  %s558_s1, 2048, %s54_s26, [#allocation7], %s491_s28, %s491_s28, %s492_s29  }
  0x18   :  { %477 = dma.done.wait [#allocation4], 1024  }
  0x19   :  { %478 = vsyncadd [#allocation4], 4294966272 }
  0x1a   :  { %479 = dma.done.wait [#allocation7], 2048  }
  0x1b   :  { %480 = vsyncadd [#allocation7], 4294965248  ;;  %v493_v0 = vmov 0.0   ;;  %vm494_vm0 = vmmov 0   ;;  %v270_v1 = vld [vmem:[#allocation6 + $0x78] sm:$0xff]  ;;  %v269_v2 = vld [vmem:[#allocation6 + $0x70] sm:$0xff] }
  0x1c   :  { %387 = vmatprep.subr.mxu0 %v493_v0  ;;  %419 = vmatprep.mubr.msk.f32.mxu0 %vm494_vm0, %v493_v0  ;;  %v268_v3 = vld [vmem:[#allocation6 + $0x68] sm:$0xff]  ;;  %v267_v4 = vld [vmem:[#allocation6 + $0x60] sm:$0xff]  ;;  %v266_v5 = vld [vmem:[#allocation6 + $0x58] sm:$0xff]  ;;  %vm171_vm1 = vcmask 1041408   ;;  %vm236_vm2 = vcmask 1041409   ;;  %vm238_vm3 = vcmask 1042434  }
  0x1d   :  { %388 = vmatpush3.msra.mxu0 %v270_v1  ;;  %v163_v6 = vld [vmem:[#allocation3] sm:$0x3]  ;;  %v164_v7 = vld [vmem:[#allocation3 + $0x8] sm:$0x3]  ;;  %v165_v8 = vld [vmem:[#allocation3 + $0x10] sm:$0x3] }
  0x1e   :  { %389 = vmatprep.subr.mxu0 %v493_v0  ;;  %v166_v9 = vld [vmem:[#allocation3 + $0x18] sm:$0x3]  ;;  %v167_v10 = vld [vmem:[#allocation3 + $0x20] sm:$0x3]  ;;  %v168_v11 = vld [vmem:[#allocation3 + $0x28] sm:$0x3] }
  0x1f   :  { %390 = vmatpush3.msra.mxu0 %v269_v2  ;;  %v169_v12 = vld [vmem:[#allocation3 + $0x30] sm:$0x3]  ;;  %v170_v13 = vld [vmem:[#allocation3 + $0x38] sm:$0x3]  ;;  %v172_v15 = vsel %vm171_vm1, %v163_v6, 0.0  ;;  %v179_v16 = vsel %vm171_vm1, %v164_v7, 0.0 }
  0x20   :  { %391 = vmatprep.subr.mxu0 %v493_v0  ;;  %v265_v14 = vld [vmem:[#allocation6 + $0x50] sm:$0xff]  ;;  %v186_v17 = vsel %vm171_vm1, %v165_v8, 0.0  ;;  %v193_v18 = vsel %vm171_vm1, %v166_v9, 0.0  ;;  %v173_v19 = vrot.slane %v172_v15, 4  ;;  %v180_v20 = vrot.slane %v179_v16, 4  ;;  %v264_v23 = vld [vmem:[#allocation6 + $0x48] sm:$0xff] }
  0x21   :  { %392 = vmatpush3.msra.mxu0 %v268_v3  ;;  %v187_v21 = vrot.slane %v186_v17, 4  ;;  %v194_v22 = vrot.slane %v193_v18, 4  ;;  %v200_v24 = vsel %vm171_vm1, %v167_v10, 0.0  ;;  %v207_v25 = vsel %vm171_vm1, %v168_v11, 0.0  ;;  %v263_v32 = vld [vmem:[#allocation6 + $0x40] sm:$0xff]  ;;  %v262_v41 = vld [vmem:[#allocation6 + $0x38] sm:$0xff] }
  0x22   :  { %393 = vmatprep.subr.mxu0 %v493_v0  ;;  %v214_v26 = vsel %vm171_vm1, %v169_v12, 0.0  ;;  %v221_v27 = vsel %vm171_vm1, %v170_v13, 0.0  ;;  %v174_v28 = vadd.f32 %v173_v19, %v172_v15  ;;  %v181_v29 = vadd.f32 %v180_v20, %v179_v16  ;;  %v261_v50 = vld [vmem:[#allocation6 + $0x30] sm:$0xff]  ;;  %v260_v59 = vld [vmem:[#allocation6 + $0x28] sm:$0xff]  ;;  %v258_v11 = vld [vmem:[#allocation6 + $0x18] sm:$0xff] }
  0x23   :  { %394 = vmatpush3.msra.mxu0 %v267_v4  ;;  %v188_v30 = vadd.f32 %v187_v21, %v186_v17  ;;  %v195_v31 = vadd.f32 %v194_v22, %v193_v18  ;;  %v201_v33 = vrot.slane %v200_v24, 4  ;;  %v208_v34 = vrot.slane %v207_v25, 4  ;;  %v257_v16 = vld [vmem:[#allocation6 + $0x10] sm:$0xff]  ;;  %v256_v20 = vld [vmem:[#allocation6 + $0x8] sm:$0xff] }
  0x24   :  { %395 = vmatprep.subr.mxu0 %v493_v0  ;;  %v215_v35 = vrot.slane %v214_v26, 4  ;;  %v222_v36 = vrot.slane %v221_v27, 4  ;;  %v175_v37 = vrot.slane %v174_v28, 2  ;;  %v182_v38 = vrot.slane %v181_v29, 2 }
  0x25   :  { %396 = vmatpush3.msra.mxu0 %v266_v5  ;;  %v189_v39 = vrot.slane %v188_v30, 2  ;;  %v196_v40 = vrot.slane %v195_v31, 2  ;;  %v202_v42 = vadd.f32 %v201_v33, %v200_v24  ;;  %v209_v43 = vadd.f32 %v208_v34, %v207_v25  ;;  %v259_v5 = vld [vmem:[#allocation6 + $0x20] sm:$0xff] }
  0x26   :  { %397 = vmatprep.subr.mxu0 %v493_v0  ;;  %v216_v44 = vadd.f32 %v215_v35, %v214_v26  ;;  %v223_v45 = vadd.f32 %v222_v36, %v221_v27  ;;  %v176_v46 = vadd.f32 %v175_v37, %v174_v28  ;;  %v183_v47 = vadd.f32 %v182_v38, %v181_v29  ;;  %v369_v26 = vld [vmem:[%s559_s2] ss:$0 sm:$0xff] }
  0x27   :  { %398 = vmatpush3.msra.mxu0 %v265_v14  ;;  %v190_v48 = vadd.f32 %v189_v39, %v188_v30  ;;  %v197_v49 = vadd.f32 %v196_v40, %v195_v31  ;;  %v203_v51 = vrot.slane %v202_v42, 2  ;;  %v210_v52 = vrot.slane %v209_v43, 2 }
  0x28   :  { %399 = vmatprep.subr.mxu0 %v493_v0  ;;  %v217_v53 = vrot.slane %v216_v44, 2  ;;  %v224_v54 = vrot.slane %v223_v45, 2  ;;  %v177_v55 = vrot.slane %v176_v46, 1  ;;  %v184_v56 = vrot.slane %v183_v47, 1 }
  0x29   :  { %400 = vmatpush3.msra.mxu0 %v264_v23  ;;  %v191_v57 = vrot.slane %v190_v48, 1  ;;  %v198_v58 = vrot.slane %v197_v49, 1  ;;  %v204_v60 = vadd.f32 %v203_v51, %v202_v42  ;;  %v211_v61 = vadd.f32 %v210_v52, %v209_v43  ;;  %v255_v23 = vld [vmem:[#allocation6] sm:$0xff] }
  0x2a   :  { %401 = vmatprep.subr.mxu0 %v493_v0  ;;  %v218_v62 = vadd.f32 %v217_v53, %v216_v44  ;;  %v225_v63 = vadd.f32 %v224_v54, %v223_v45  ;;  %v178_v1 = vadd.f32 %v177_v55, %v176_v46  ;;  %v185_v2 = vadd.f32 %v184_v56, %v183_v47 }
  0x2b   :  { %402 = vmatpush3.msra.mxu0 %v263_v32  ;;  %v192_v3 = vadd.f32 %v191_v57, %v190_v48  ;;  %v199_v4 = vadd.f32 %v198_v58, %v197_v49  ;;  %v205_v6 = vrot.slane %v204_v60, 1  ;;  %v212_v7 = vrot.slane %v211_v61, 1 }
  0x2c   :  { %403 = vmatprep.subr.mxu0 %v493_v0  ;;  %v219_v8 = vrot.slane %v218_v62, 1  ;;  %v226_v9 = vrot.slane %v225_v63, 1  ;;  %v237_v10 = vsel %vm236_vm2, %v185_v2, %v178_v1  ;;  %vm240_vm4 = vcmask 1043459  }
  0x2d   :  { %404 = vmatpush3.msra.mxu0 %v262_v41  ;;  %v206_v12 = vadd.f32 %v205_v6, %v204_v60  ;;  %v213_v13 = vadd.f32 %v212_v7, %v211_v61  ;;  %vm242_vm5 = vcmask 1044484   ;;  %v239_v15 = vsel %vm238_vm3, %v192_v3, %v237_v10 }
  0x2e   :  { %405 = vmatprep.subr.mxu0 %v493_v0  ;;  %v220_v14 = vadd.f32 %v219_v8, %v218_v62  ;;  %vm244_vm6 = vcmask 1045509   ;;  %v227_v17 = vadd.f32 %v226_v9, %v225_v63  ;;  %v241_v18 = vsel %vm240_vm4, %v199_v4, %v239_v15 }
  0x2f   :  { %406 = vmatpush3.msra.mxu0 %v261_v50  ;;  %vm246_vm7 = vcmask 1046534   ;;  %v243_v19 = vsel %vm242_vm5, %v206_v12, %v241_v18  ;;  %vm248_vm8 = vcmask 1047559  }
  0x30   :  { %407 = vmatprep.subr.mxu0 %v493_v0  ;;  %v245_v21 = vsel %vm244_vm6, %v213_v13, %v243_v19 }
  0x31   :  { %408 = vmatpush3.msra.mxu0 %v260_v59  ;;  %v247_v22 = vsel %vm246_vm7, %v220_v14, %v245_v21 }
  0x32   :  { %409 = vmatprep.subr.mxu0 %v493_v0  ;;  %v249_v24 = vsel %vm248_vm8, %v227_v17, %v247_v22 }
  0x33   :  { %410 = vmatpush3.msra.mxu0 %v259_v5  ;;  %v254_v25 = vmul.f32 0.125, %v249_v24 }
  0x34   :  { %411 = vmatprep.subr.mxu0 %v493_v0 }
  0x35   :  { %412 = vmatpush3.msra.mxu0 %v258_v11 }
  0x36   :  { %413 = vmatprep.subr.mxu0 %v493_v0 }
  0x37   :  { %414 = vmatpush3.msra.mxu0 %v257_v16 }
  0x38   :  { %415 = vmatprep.subr.mxu0 %v493_v0 }
  0x39   :  { %416 = vmatpush3.msra.mxu0 %v256_v20 }
  0x3a   :  { %417 = vmatprep.subr.mxu0 %v493_v0 }
  0x3b   :  { %418 = vmatpush3.msra.mxu0 %v255_v23 }
  0x3c   :  { %420 = vmatmul.mubr.f32.vlgmr.msra.gmra.mxu0 %v254_v25 }
  0xfc   :  { %v344_v27 = vpop.f32.mrf.mxu0 }
  0xfd   :  { %v345_v28 = vadd.f32 %v369_v26, %v344_v27 }
  0xfe   :  { %v421_v29 = vpop.f32.mrf.mxu0 }
  0xff   :  { %348 = vst [vmem:[#allocation8] sm:$0xff] %v345_v28 }
 0x100   :  { %353 = vsyncadd [#allocation5], 96  ;;  %s495_s5 = smov [#allocation8]  }
 0x101   :  { %s354_s6 = sshll.u32 %s495_s5, 4  ;;  %s355_s6 = int_to_ptr.vmem [resolvable:$true] %s354_s6 }
 0x102   :  { %s457_s7 = scalar_lea.vmem %s355_s6, 32  ;;  %s461_s8 = scalar_lea.vmem %s355_s6, 128 }
 0x103   :  { %p458_p5 = scmp.ne.s32.totalorder %s355_s6, %s457_s7  ;;  %p462_p6 = scmp.lt.s32.totalorder %s355_s6, %s355_s6 }
 0x104   :  { %p463_p7 = scmp.lt.s32.totalorder %s461_s8, %s457_s7 }
 0x106   :  { %p464_p8 = por %p463_p7, %p462_p6 }
 0x108   :  { %p465_p9 = pnand %p464_p8, %p458_p5 }
 0x10a   :  { %468 = shalt.err (!%p465_p9)
}
 0x10b   :  { %s496_s9 = smov 32   ;;  %s497_s10 = smov 2  }
 0x10c   :  { %360 = dma.vmem_to_hbm [thread:$0]  %s355_s6, 32, %s560_s3, [#allocation5], %s496_s9, %s496_s9, %s497_s10  }
 0x10d   :  { %481 = dma.done.wait [#allocation5], 128  }
 0x10e   :  { %482 = vsyncadd [#allocation5], 4294967168 }
 0x10f   :  { %364 = vsyncpa [#allocation4], 1 }
 0x110   :  { %365 = vsyncpa [#allocation7], 1 }
 0x111   :  { %366 = vsyncpa [#allocation5], 1 }

</bundles_post_ra>
